<compile_context>
chip_gen: v5e
topology: v5e:2x2
jax: 0.10.0
libtpu: 0.0.40
codegen_flags: <defaults>
</compile_context>

<pallas_src>
import functools

import jax
import jax.numpy as jnp
from jax import lax
from jax.experimental import pallas as pl
from jax.experimental.pallas import tpu as pltpu


def _attention_kernel(x_ref, wqkv_ref, bqkv_ref, wproj_ref, bproj_ref, o_ref,
                      attn_ref, *, num_heads, scale):
    """One grid step = `batch_block` batch elements.

    x_ref    : (B_blk, N, C)   input tokens
    wqkv_ref : (C, 3C)         fused QKV projection weights (in, out layout)
    bqkv_ref : (1, 3C)         fused QKV bias
    wproj_ref: (C, C)          output projection weights
    bproj_ref: (1, C)          output projection bias
    o_ref    : (B_blk, N, C)   output tokens
    attn_ref : (B_blk*N, C)    VMEM scratch holding merged per-head outputs
    """
    Bb, N, C = x_ref.shape
    D = C // num_heads
    M = Bb * N
    cdt = x_ref.dtype  # MXU operand dtype (bf16 on v6e/v7x for full throughput)

    # Fold batch rows into one (M, C) slab -> one MXU call per dense matmul.
    x2d = x_ref[...].reshape(M, C)

    # ---- fused QKV projection: one MXU matmul (f32 accumulation) + bias ----
    qkv = jnp.dot(x2d, wqkv_ref[...], preferred_element_type=jnp.float32)
    qkv = qkv + bqkv_ref[...].astype(jnp.float32)                  # (M, 3C)

    # ---- per-(batch, head) attention: static, fully unrolled loops --------
    # Heads write directly into the VMEM scratch (no concatenate).
    # TODO(synk): if num_heads grows (H=12/16), move heads to the sublane axis
    # with a single pltpu.einshape after the QKV matmul instead of H*3 lane
    # slices of width D.
    for b in range(Bb):
        r0 = b * N
        for h in range(num_heads):
            q = qkv[r0:r0 + N, h * D:(h + 1) * D].astype(cdt)          # (N, D)
            k = qkv[r0:r0 + N, C + h * D:C + (h + 1) * D].astype(cdt)  # (N, D)
            v = qkv[r0:r0 + N, 2 * C + h * D:2 * C + (h + 1) * D].astype(cdt)

            # q @ k^T without materializing a transpose: contract last dims.
            s = lax.dot_general(q, k, (((1,), (1,)), ((), ())),
                                preferred_element_type=jnp.float32) * scale

            # numerically stable softmax with deferred normalization
            s = s - jnp.max(s, axis=-1, keepdims=True)
            p = jnp.exp(s)                                       # (N, N) f32
            l = jnp.sum(p, axis=-1, keepdims=True)               # (N, 1)

            o_h = jnp.dot(p.astype(cdt), v,
                          preferred_element_type=jnp.float32)    # (N, D)
            # normalize the (N, D) output (EUP reciprocal), not the (N, N) p
            o_h = o_h * pl.reciprocal(l, approx=True)

            attn_ref[r0:r0 + N, h * D:(h + 1) * D] = o_h.astype(attn_ref.dtype)

    # ---- output projection: one MXU matmul over all M rows + bias ---------
    out = jnp.dot(attn_ref[...], wproj_ref[...],
                  preferred_element_type=jnp.float32)
    out = out + bproj_ref[...].astype(jnp.float32)

    # attn_drop / proj_drop have p=0.0 -> identity (eval mode); omitted.
    o_ref[...] = out.reshape(Bb, N, C).astype(o_ref.dtype)


@functools.partial(jax.jit, static_argnames=("num_heads", "batch_block"))
def attention_forward(x, params, *, num_heads, batch_block=None):
    """x: (B, N, C). Returns (B, N, C) in x.dtype.

    batch_block: batch elements per grid step. Default B (one step, best for
    v5e/v6e). On v7x pass B//2 so the two TensorCores each take a block.
    """
    B, N, C = x.shape
    assert C % num_heads == 0
    if batch_block is None:
        batch_block = B
    assert B % batch_block == 0
    num_blocks = B // batch_block
    D = C // num_heads
    scale = float(D ** -0.5)

    kernel = functools.partial(_attention_kernel,
                               num_heads=num_heads, scale=scale)

    # Grid-invariant weights: constant index_map -> not re-DMA'd across steps.
    # (At production sizes also pass pipeline_mode=pl.Buffered(1) here.)
    weight = lambda shape: pl.BlockSpec(shape, lambda i: (0,) * len(shape))

    itemsize = jnp.dtype(x.dtype).itemsize
    flops = 2 * B * N * C * (3 * C) + 4 * B * N * N * C + 2 * B * N * C * C
    bytes_accessed = (2 * B * N * C + C * 3 * C + 3 * C + C * C + C) * itemsize
    cost = pl.CostEstimate(flops=int(flops),
                           transcendentals=int(B * num_heads * N * N),
                           bytes_accessed=int(bytes_accessed))

    return pl.pallas_call(
        kernel,
        out_shape=jax.ShapeDtypeStruct((B, N, C), x.dtype),
        grid_spec=pltpu.PrefetchScalarGridSpec(
            num_scalar_prefetch=0,
            grid=(num_blocks,),
            in_specs=[
                pl.BlockSpec((batch_block, N, C), lambda i: (i, 0, 0)),  # x
                weight((C, 3 * C)),                                      # wqkv
                weight((1, 3 * C)),                                      # bqkv
                weight((C, C)),                                          # wproj
                weight((1, C)),                                          # bproj
            ],
            out_specs=pl.BlockSpec((batch_block, N, C), lambda i: (i, 0, 0)),
            scratch_shapes=[pltpu.VMEM((batch_block * N, C), x.dtype)],
        ),
        compiler_params=pltpu.CompilerParams(
            dimension_semantics=("parallel",)),
        cost_estimate=cost,
    )(x, params["wqkv"], params["bqkv"], params["wproj"], params["bproj"])


def make_params(key, dim):
    """Deterministic synthetic parameters.

    Linear weights are stored (in, out) so the kernel computes x @ W + b
    (equivalent to PyTorch's x @ W.T + b with W stored (out, in)).
    The QKV output columns are ordered [q | k | v], each of width `dim`,
    matching the PyTorch reshape(B, N, 3, H, D) convention.
    """
    ks = jax.random.split(key, 4)
    s = dim ** -0.5
    wqkv = jax.random.normal(ks[0], (dim, 3 * dim), jnp.float32) * s
    bqkv = jax.random.normal(ks[1], (1, 3 * dim), jnp.float32) * 0.02
    wproj = jax.random.normal(ks[2], (dim, dim), jnp.float32) * s
    bproj = jax.random.normal(ks[3], (1, dim), jnp.float32) * 0.02
    return dict(wqkv=wqkv, bqkv=bqkv, wproj=wproj, bproj=bproj)


def reference_forward(x, params, num_heads):
    """Pure-JAX reference matching the PyTorch module (eval mode)."""
    B, N, C = x.shape
    D = C // num_heads
    hi = lax.Precision.HIGHEST

    qkv = jnp.einsum("bnc,cd->bnd", x, params["wqkv"], precision=hi)
    qkv = qkv + params["bqkv"][0]                              # (B, N, 3C)
    qkv = qkv.reshape(B, N, 3, num_heads, D).transpose(2, 0, 3, 1, 4)
    q, k, v = qkv[0], qkv[1], qkv[2]                           # (B, H, N, D)

    attn = jnp.einsum("bhnd,bhmd->bhnm", q, k, precision=hi) * (D ** -0.5)
    attn = jax.nn.softmax(attn, axis=-1)
    y = jnp.einsum("bhnm,bhmd->bhnd", attn, v, precision=hi)   # (B, H, N, D)
    y = y.transpose(0, 2, 1, 3).reshape(B, N, C)

    y = jnp.einsum("bnc,cd->bnd", y, params["wproj"], precision=hi)
    return y + params["bproj"][0]


if __name__ == "__main__":
    key = jax.random.PRNGKey(0)
    B, N, C = 2, 16, 64          # batch, sequence length, embedding dim
    num_heads = 4                # head_dim = 16 (dim % num_heads == 0)

    kx, kp = jax.random.split(key)
    x = jax.random.normal(kx, (B, N, C), jnp.float32)
    params = make_params(kp, C)

    # f32 path (strict check; tolerance covers default MXU precision +
    # approximate EUP reciprocal in the deferred softmax normalization).
    out = attention_forward(x, params, num_heads=num_heads)
    out = jax.block_until_ready(out)
    ref = reference_forward(x, params, num_heads)
    assert out.shape == (B, N, C)
    if not jnp.allclose(out, ref, atol=2e-3, rtol=2e-3):
        err = float(jnp.max(jnp.abs(out - ref)))
        raise AssertionError(f"Pallas kernel does not match reference, max err={err}")

    # bf16 operand path (full-rate MXU on v6e/v7x): smoke test with loose
    # tolerance — bf16 operand rounding dominates, softmax/accum stay f32.
    x_bf16 = x.astype(jnp.bfloat16)
    params_bf16 = jax.tree.map(lambda a: a.astype(jnp.bfloat16), params)
    out_bf16 = attention_forward(x_bf16, params_bf16, num_heads=num_heads)
    out_bf16 = jax.block_until_ready(out_bf16).astype(jnp.float32)
    assert out_bf16.shape == (B, N, C)
    assert bool(jnp.all(jnp.isfinite(out_bf16)))
    if float(jnp.max(jnp.abs(out_bf16 - ref))) > 0.25:
        raise AssertionError("bf16 Pallas path diverges from reference")

    print("KERNEL_OK")
</pallas_src>

<mosaic_0001>
module attributes {stable_mosaic.version = 11 : i64} {
  func.func @_attention_kernel(%arg0: i32, %arg1: memref<2x16x64xf32, #tpu.memory_space<vmem>>, %arg2: memref<64x192xf32, #tpu.memory_space<vmem>>, %arg3: memref<1x192xf32, #tpu.memory_space<vmem>>, %arg4: memref<64x64xf32, #tpu.memory_space<vmem>>, %arg5: memref<1x64xf32, #tpu.memory_space<vmem>>, %arg6: memref<2x16x64xf32, #tpu.memory_space<vmem>>, %arg7: memref<32x64xf32, #tpu.memory_space<vmem>>) attributes {dimension_semantics = [#tpu.dimension_semantics<parallel>], iteration_bounds = array<i64: 1>, scalar_prefetch = 0 : i64, scratch_operands = 1 : i64, tpu.core_type = #tpu.core_type<tc>, window_params = [{transform_indices = @transform_0, window_bounds = array<i64: 2, 16, 64>}, {pipeline_mode = #tpu.pipeline_mode<synchronous>, transform_indices = @transform_1, window_bounds = array<i64: 64, 192>}, {pipeline_mode = #tpu.pipeline_mode<synchronous>, transform_indices = @transform_2, window_bounds = array<i64: 1, 192>}, {pipeline_mode = #tpu.pipeline_mode<synchronous>, transform_indices = @transform_3, window_bounds = array<i64: 64, 64>}, {pipeline_mode = #tpu.pipeline_mode<synchronous>, transform_indices = @transform_4, window_bounds = array<i64: 1, 64>}, {transform_indices = @transform_5, window_bounds = array<i64: 2, 16, 64>}]} {
    %c0 = arith.constant 0 : index
    %c0_0 = arith.constant 0 : index
    %c0_1 = arith.constant 0 : index
    %0 = vector.load %arg1[%c0, %c0_0, %c0_1] : memref<2x16x64xf32, #tpu.memory_space<vmem>>, vector<2x16x64xf32>
    %1 = vector.shape_cast %0 : vector<2x16x64xf32> to vector<32x64xf32>
    %c0_2 = arith.constant 0 : index
    %c0_3 = arith.constant 0 : index
    %2 = vector.load %arg2[%c0_2, %c0_3] : memref<64x192xf32, #tpu.memory_space<vmem>>, vector<64x192xf32>
    %cst = arith.constant dense<0.000000e+00> : vector<32x192xf32>
    %3 = tpu.matmul %1, %2, %cst {dimension_numbers = #tpu.dot_dimension_numbers<[1], [0], [0], [1], [0, 0, 1, 1], [], []>} : vector<32x64xf32>, vector<64x192xf32>, vector<32x192xf32> -> vector<32x192xf32>
    %c0_4 = arith.constant 0 : index
    %c0_5 = arith.constant 0 : index
    %4 = vector.load %arg3[%c0_4, %c0_5] : memref<1x192xf32, #tpu.memory_space<vmem>>, vector<1x192xf32>
    %5 = vector.broadcast %4 : vector<1x192xf32> to vector<32x192xf32>
    %6 = arith.addf %3, %5 : vector<32x192xf32>
    %7 = vector.extract_strided_slice %6 {offsets = [0, 0], sizes = [16, 16], strides = [1, 1]} : vector<32x192xf32> to vector<16x16xf32>
    %8 = vector.extract_strided_slice %6 {offsets = [0, 64], sizes = [16, 16], strides = [1, 1]} : vector<32x192xf32> to vector<16x16xf32>
    %9 = vector.extract_strided_slice %6 {offsets = [0, 128], sizes = [16, 16], strides = [1, 1]} : vector<32x192xf32> to vector<16x16xf32>
    %cst_6 = arith.constant dense<0.000000e+00> : vector<16x16xf32>
    %10 = tpu.matmul %7, %8, %cst_6 {dimension_numbers = #tpu.dot_dimension_numbers<[1], [1], [0], [0], [0, 0, 1, 0], [], []>} : vector<16x16xf32>, vector<16x16xf32>, vector<16x16xf32> -> vector<16x16xf32>
    %cst_7 = arith.constant 2.500000e-01 : f32
    %11 = vector.broadcast %cst_7 : f32 to vector<16x16xf32>
    %12 = arith.mulf %10, %11 : vector<16x16xf32>
    %cst_8 = arith.constant dense<0xFF800000> : vector<16xf32>
    %13 = vector.multi_reduction <maximumf>, %12, %cst_8 [1] : vector<16x16xf32> to vector<16xf32>
    %14 = vector.shape_cast %13 : vector<16xf32> to vector<16x1xf32>
    %15 = vector.broadcast %14 : vector<16x1xf32> to vector<16x16xf32>
    %16 = arith.subf %12, %15 : vector<16x16xf32>
    %17 = math.exp %16 : vector<16x16xf32>
    %cst_9 = arith.constant dense<0.000000e+00> : vector<16xf32>
    %18 = vector.multi_reduction <add>, %17, %cst_9 [1] : vector<16x16xf32> to vector<16xf32>
    %19 = vector.shape_cast %18 : vector<16xf32> to vector<16x1xf32>
    %cst_10 = arith.constant dense<0.000000e+00> : vector<16x16xf32>
    %20 = tpu.matmul %17, %9, %cst_10 {dimension_numbers = #tpu.dot_dimension_numbers<[1], [0], [0], [1], [0, 0, 1, 1], [], []>} : vector<16x16xf32>, vector<16x16xf32>, vector<16x16xf32> -> vector<16x16xf32>
    %21 = tpu.reciprocal %19 {approx = true} : vector<16x1xf32> -> vector<16x1xf32>
    %22 = vector.broadcast %21 : vector<16x1xf32> to vector<16x16xf32>
    %23 = arith.mulf %20, %22 : vector<16x16xf32>
    %c0_11 = arith.constant 0 : index
    %c0_12 = arith.constant 0 : index
    %24 = vector.load %arg7[%c0_11, %c0_12] : memref<32x64xf32, #tpu.memory_space<vmem>>, vector<16x16xf32>
    tpu.vector_store %arg7[%c0_11, %c0_12], %23 {strides = array<i32>} : memref<32x64xf32, #tpu.memory_space<vmem>>, vector<16x16xf32>,
    %25 = vector.extract_strided_slice %6 {offsets = [0, 16], sizes = [16, 16], strides = [1, 1]} : vector<32x192xf32> to vector<16x16xf32>
    %26 = vector.extract_strided_slice %6 {offsets = [0, 80], sizes = [16, 16], strides = [1, 1]} : vector<32x192xf32> to vector<16x16xf32>
    %27 = vector.extract_strided_slice %6 {offsets = [0, 144], sizes = [16, 16], strides = [1, 1]} : vector<32x192xf32> to vector<16x16xf32>
    %cst_13 = arith.constant dense<0.000000e+00> : vector<16x16xf32>
    %28 = tpu.matmul %25, %26, %cst_13 {dimension_numbers = #tpu.dot_dimension_numbers<[1], [1], [0], [0], [0, 0, 1, 0], [], []>} : vector<16x16xf32>, vector<16x16xf32>, vector<16x16xf32> -> vector<16x16xf32>
    %cst_14 = arith.constant 2.500000e-01 : f32
    %29 = vector.broadcast %cst_14 : f32 to vector<16x16xf32>
    %30 = arith.mulf %28, %29 : vector<16x16xf32>
    %cst_15 = arith.constant dense<0xFF800000> : vector<16xf32>
    %31 = vector.multi_reduction <maximumf>, %30, %cst_15 [1] : vector<16x16xf32> to vector<16xf32>
    %32 = vector.shape_cast %31 : vector<16xf32> to vector<16x1xf32>
    %33 = vector.broadcast %32 : vector<16x1xf32> to vector<16x16xf32>
    %34 = arith.subf %30, %33 : vector<16x16xf32>
    %35 = math.exp %34 : vector<16x16xf32>
    %cst_16 = arith.constant dense<0.000000e+00> : vector<16xf32>
    %36 = vector.multi_reduction <add>, %35, %cst_16 [1] : vector<16x16xf32> to vector<16xf32>
    %37 = vector.shape_cast %36 : vector<16xf32> to vector<16x1xf32>
    %cst_17 = arith.constant dense<0.000000e+00> : vector<16x16xf32>
    %38 = tpu.matmul %35, %27, %cst_17 {dimension_numbers = #tpu.dot_dimension_numbers<[1], [0], [0], [1], [0, 0, 1, 1], [], []>} : vector<16x16xf32>, vector<16x16xf32>, vector<16x16xf32> -> vector<16x16xf32>
    %39 = tpu.reciprocal %37 {approx = true} : vector<16x1xf32> -> vector<16x1xf32>
    %40 = vector.broadcast %39 : vector<16x1xf32> to vector<16x16xf32>
    %41 = arith.mulf %38, %40 : vector<16x16xf32>
    %c0_18 = arith.constant 0 : index
    %c16 = arith.constant 16 : index
    %42 = vector.load %arg7[%c0_18, %c16] : memref<32x64xf32, #tpu.memory_space<vmem>>, vector<16x16xf32>
    tpu.vector_store %arg7[%c0_18, %c16], %41 {strides = array<i32>} : memref<32x64xf32, #tpu.memory_space<vmem>>, vector<16x16xf32>,
    %43 = vector.extract_strided_slice %6 {offsets = [0, 32], sizes = [16, 16], strides = [1, 1]} : vector<32x192xf32> to vector<16x16xf32>
    %44 = vector.extract_strided_slice %6 {offsets = [0, 96], sizes = [16, 16], strides = [1, 1]} : vector<32x192xf32> to vector<16x16xf32>
    %45 = vector.extract_strided_slice %6 {offsets = [0, 160], sizes = [16, 16], strides = [1, 1]} : vector<32x192xf32> to vector<16x16xf32>
    %cst_19 = arith.constant dense<0.000000e+00> : vector<16x16xf32>
    %46 = tpu.matmul %43, %44, %cst_19 {dimension_numbers = #tpu.dot_dimension_numbers<[1], [1], [0], [0], [0, 0, 1, 0], [], []>} : vector<16x16xf32>, vector<16x16xf32>, vector<16x16xf32> -> vector<16x16xf32>
    %cst_20 = arith.constant 2.500000e-01 : f32
    %47 = vector.broadcast %cst_20 : f32 to vector<16x16xf32>
    %48 = arith.mulf %46, %47 : vector<16x16xf32>
    %cst_21 = arith.constant dense<0xFF800000> : vector<16xf32>
    %49 = vector.multi_reduction <maximumf>, %48, %cst_21 [1] : vector<16x16xf32> to vector<16xf32>
    %50 = vector.shape_cast %49 : vector<16xf32> to vector<16x1xf32>
    %51 = vector.broadcast %50 : vector<16x1xf32> to vector<16x16xf32>
    %52 = arith.subf %48, %51 : vector<16x16xf32>
    %53 = math.exp %52 : vector<16x16xf32>
    %cst_22 = arith.constant dense<0.000000e+00> : vector<16xf32>
    %54 = vector.multi_reduction <add>, %53, %cst_22 [1] : vector<16x16xf32> to vector<16xf32>
    %55 = vector.shape_cast %54 : vector<16xf32> to vector<16x1xf32>
    %cst_23 = arith.constant dense<0.000000e+00> : vector<16x16xf32>
    %56 = tpu.matmul %53, %45, %cst_23 {dimension_numbers = #tpu.dot_dimension_numbers<[1], [0], [0], [1], [0, 0, 1, 1], [], []>} : vector<16x16xf32>, vector<16x16xf32>, vector<16x16xf32> -> vector<16x16xf32>
    %57 = tpu.reciprocal %55 {approx = true} : vector<16x1xf32> -> vector<16x1xf32>
    %58 = vector.broadcast %57 : vector<16x1xf32> to vector<16x16xf32>
    %59 = arith.mulf %56, %58 : vector<16x16xf32>
    %c0_24 = arith.constant 0 : index
    %c32 = arith.constant 32 : index
    %60 = vector.load %arg7[%c0_24, %c32] : memref<32x64xf32, #tpu.memory_space<vmem>>, vector<16x16xf32>
    tpu.vector_store %arg7[%c0_24, %c32], %59 {strides = array<i32>} : memref<32x64xf32, #tpu.memory_space<vmem>>, vector<16x16xf32>,
    %61 = vector.extract_strided_slice %6 {offsets = [0, 48], sizes = [16, 16], strides = [1, 1]} : vector<32x192xf32> to vector<16x16xf32>
    %62 = vector.extract_strided_slice %6 {offsets = [0, 112], sizes = [16, 16], strides = [1, 1]} : vector<32x192xf32> to vector<16x16xf32>
    %63 = vector.extract_strided_slice %6 {offsets = [0, 176], sizes = [16, 16], strides = [1, 1]} : vector<32x192xf32> to vector<16x16xf32>
    %cst_25 = arith.constant dense<0.000000e+00> : vector<16x16xf32>
    %64 = tpu.matmul %61, %62, %cst_25 {dimension_numbers = #tpu.dot_dimension_numbers<[1], [1], [0], [0], [0, 0, 1, 0], [], []>} : vector<16x16xf32>, vector<16x16xf32>, vector<16x16xf32> -> vector<16x16xf32>
    %cst_26 = arith.constant 2.500000e-01 : f32
    %65 = vector.broadcast %cst_26 : f32 to vector<16x16xf32>
    %66 = arith.mulf %64, %65 : vector<16x16xf32>
    %cst_27 = arith.constant dense<0xFF800000> : vector<16xf32>
    %67 = vector.multi_reduction <maximumf>, %66, %cst_27 [1] : vector<16x16xf32> to vector<16xf32>
    %68 = vector.shape_cast %67 : vector<16xf32> to vector<16x1xf32>
    %69 = vector.broadcast %68 : vector<16x1xf32> to vector<16x16xf32>
    %70 = arith.subf %66, %69 : vector<16x16xf32>
    %71 = math.exp %70 : vector<16x16xf32>
    %cst_28 = arith.constant dense<0.000000e+00> : vector<16xf32>
    %72 = vector.multi_reduction <add>, %71, %cst_28 [1] : vector<16x16xf32> to vector<16xf32>
    %73 = vector.shape_cast %72 : vector<16xf32> to vector<16x1xf32>
    %cst_29 = arith.constant dense<0.000000e+00> : vector<16x16xf32>
    %74 = tpu.matmul %71, %63, %cst_29 {dimension_numbers = #tpu.dot_dimension_numbers<[1], [0], [0], [1], [0, 0, 1, 1], [], []>} : vector<16x16xf32>, vector<16x16xf32>, vector<16x16xf32> -> vector<16x16xf32>
    %75 = tpu.reciprocal %73 {approx = true} : vector<16x1xf32> -> vector<16x1xf32>
    %76 = vector.broadcast %75 : vector<16x1xf32> to vector<16x16xf32>
    %77 = arith.mulf %74, %76 : vector<16x16xf32>
    %c0_30 = arith.constant 0 : index
    %c48 = arith.constant 48 : index
    %78 = vector.load %arg7[%c0_30, %c48] : memref<32x64xf32, #tpu.memory_space<vmem>>, vector<16x16xf32>
    tpu.vector_store %arg7[%c0_30, %c48], %77 {strides = array<i32>} : memref<32x64xf32, #tpu.memory_space<vmem>>, vector<16x16xf32>,
    %79 = vector.extract_strided_slice %6 {offsets = [16, 0], sizes = [16, 16], strides = [1, 1]} : vector<32x192xf32> to vector<16x16xf32>
    %80 = vector.extract_strided_slice %6 {offsets = [16, 64], sizes = [16, 16], strides = [1, 1]} : vector<32x192xf32> to vector<16x16xf32>
    %81 = vector.extract_strided_slice %6 {offsets = [16, 128], sizes = [16, 16], strides = [1, 1]} : vector<32x192xf32> to vector<16x16xf32>
    %cst_31 = arith.constant dense<0.000000e+00> : vector<16x16xf32>
    %82 = tpu.matmul %79, %80, %cst_31 {dimension_numbers = #tpu.dot_dimension_numbers<[1], [1], [0], [0], [0, 0, 1, 0], [], []>} : vector<16x16xf32>, vector<16x16xf32>, vector<16x16xf32> -> vector<16x16xf32>
    %cst_32 = arith.constant 2.500000e-01 : f32
    %83 = vector.broadcast %cst_32 : f32 to vector<16x16xf32>
    %84 = arith.mulf %82, %83 : vector<16x16xf32>
    %cst_33 = arith.constant dense<0xFF800000> : vector<16xf32>
    %85 = vector.multi_reduction <maximumf>, %84, %cst_33 [1] : vector<16x16xf32> to vector<16xf32>
    %86 = vector.shape_cast %85 : vector<16xf32> to vector<16x1xf32>
    %87 = vector.broadcast %86 : vector<16x1xf32> to vector<16x16xf32>
    %88 = arith.subf %84, %87 : vector<16x16xf32>
    %89 = math.exp %88 : vector<16x16xf32>
    %cst_34 = arith.constant dense<0.000000e+00> : vector<16xf32>
    %90 = vector.multi_reduction <add>, %89, %cst_34 [1] : vector<16x16xf32> to vector<16xf32>
    %91 = vector.shape_cast %90 : vector<16xf32> to vector<16x1xf32>
    %cst_35 = arith.constant dense<0.000000e+00> : vector<16x16xf32>
    %92 = tpu.matmul %89, %81, %cst_35 {dimension_numbers = #tpu.dot_dimension_numbers<[1], [0], [0], [1], [0, 0, 1, 1], [], []>} : vector<16x16xf32>, vector<16x16xf32>, vector<16x16xf32> -> vector<16x16xf32>
    %93 = tpu.reciprocal %91 {approx = true} : vector<16x1xf32> -> vector<16x1xf32>
    %94 = vector.broadcast %93 : vector<16x1xf32> to vector<16x16xf32>
    %95 = arith.mulf %92, %94 : vector<16x16xf32>
    %c16_36 = arith.constant 16 : index
    %c0_37 = arith.constant 0 : index
    %96 = vector.load %arg7[%c16_36, %c0_37] : memref<32x64xf32, #tpu.memory_space<vmem>>, vector<16x16xf32>
    tpu.vector_store %arg7[%c16_36, %c0_37], %95 {strides = array<i32>} : memref<32x64xf32, #tpu.memory_space<vmem>>, vector<16x16xf32>,
    %97 = vector.extract_strided_slice %6 {offsets = [16, 16], sizes = [16, 16], strides = [1, 1]} : vector<32x192xf32> to vector<16x16xf32>
    %98 = vector.extract_strided_slice %6 {offsets = [16, 80], sizes = [16, 16], strides = [1, 1]} : vector<32x192xf32> to vector<16x16xf32>
    %99 = vector.extract_strided_slice %6 {offsets = [16, 144], sizes = [16, 16], strides = [1, 1]} : vector<32x192xf32> to vector<16x16xf32>
    %cst_38 = arith.constant dense<0.000000e+00> : vector<16x16xf32>
    %100 = tpu.matmul %97, %98, %cst_38 {dimension_numbers = #tpu.dot_dimension_numbers<[1], [1], [0], [0], [0, 0, 1, 0], [], []>} : vector<16x16xf32>, vector<16x16xf32>, vector<16x16xf32> -> vector<16x16xf32>
    %cst_39 = arith.constant 2.500000e-01 : f32
    %101 = vector.broadcast %cst_39 : f32 to vector<16x16xf32>
    %102 = arith.mulf %100, %101 : vector<16x16xf32>
    %cst_40 = arith.constant dense<0xFF800000> : vector<16xf32>
    %103 = vector.multi_reduction <maximumf>, %102, %cst_40 [1] : vector<16x16xf32> to vector<16xf32>
    %104 = vector.shape_cast %103 : vector<16xf32> to vector<16x1xf32>
    %105 = vector.broadcast %104 : vector<16x1xf32> to vector<16x16xf32>
    %106 = arith.subf %102, %105 : vector<16x16xf32>
    %107 = math.exp %106 : vector<16x16xf32>
    %cst_41 = arith.constant dense<0.000000e+00> : vector<16xf32>
    %108 = vector.multi_reduction <add>, %107, %cst_41 [1] : vector<16x16xf32> to vector<16xf32>
    %109 = vector.shape_cast %108 : vector<16xf32> to vector<16x1xf32>
    %cst_42 = arith.constant dense<0.000000e+00> : vector<16x16xf32>
    %110 = tpu.matmul %107, %99, %cst_42 {dimension_numbers = #tpu.dot_dimension_numbers<[1], [0], [0], [1], [0, 0, 1, 1], [], []>} : vector<16x16xf32>, vector<16x16xf32>, vector<16x16xf32> -> vector<16x16xf32>
    %111 = tpu.reciprocal %109 {approx = true} : vector<16x1xf32> -> vector<16x1xf32>
    %112 = vector.broadcast %111 : vector<16x1xf32> to vector<16x16xf32>
    %113 = arith.mulf %110, %112 : vector<16x16xf32>
    %c16_43 = arith.constant 16 : index
    %c16_44 = arith.constant 16 : index
    %114 = vector.load %arg7[%c16_43, %c16_44] : memref<32x64xf32, #tpu.memory_space<vmem>>, vector<16x16xf32>
    tpu.vector_store %arg7[%c16_43, %c16_44], %113 {strides = array<i32>} : memref<32x64xf32, #tpu.memory_space<vmem>>, vector<16x16xf32>,
    %115 = vector.extract_strided_slice %6 {offsets = [16, 32], sizes = [16, 16], strides = [1, 1]} : vector<32x192xf32> to vector<16x16xf32>
    %116 = vector.extract_strided_slice %6 {offsets = [16, 96], sizes = [16, 16], strides = [1, 1]} : vector<32x192xf32> to vector<16x16xf32>
    %117 = vector.extract_strided_slice %6 {offsets = [16, 160], sizes = [16, 16], strides = [1, 1]} : vector<32x192xf32> to vector<16x16xf32>
    %cst_45 = arith.constant dense<0.000000e+00> : vector<16x16xf32>
    %118 = tpu.matmul %115, %116, %cst_45 {dimension_numbers = #tpu.dot_dimension_numbers<[1], [1], [0], [0], [0, 0, 1, 0], [], []>} : vector<16x16xf32>, vector<16x16xf32>, vector<16x16xf32> -> vector<16x16xf32>
    %cst_46 = arith.constant 2.500000e-01 : f32
    %119 = vector.broadcast %cst_46 : f32 to vector<16x16xf32>
    %120 = arith.mulf %118, %119 : vector<16x16xf32>
    %cst_47 = arith.constant dense<0xFF800000> : vector<16xf32>
    %121 = vector.multi_reduction <maximumf>, %120, %cst_47 [1] : vector<16x16xf32> to vector<16xf32>
    %122 = vector.shape_cast %121 : vector<16xf32> to vector<16x1xf32>
    %123 = vector.broadcast %122 : vector<16x1xf32> to vector<16x16xf32>
    %124 = arith.subf %120, %123 : vector<16x16xf32>
    %125 = math.exp %124 : vector<16x16xf32>
    %cst_48 = arith.constant dense<0.000000e+00> : vector<16xf32>
    %126 = vector.multi_reduction <add>, %125, %cst_48 [1] : vector<16x16xf32> to vector<16xf32>
    %127 = vector.shape_cast %126 : vector<16xf32> to vector<16x1xf32>
    %cst_49 = arith.constant dense<0.000000e+00> : vector<16x16xf32>
    %128 = tpu.matmul %125, %117, %cst_49 {dimension_numbers = #tpu.dot_dimension_numbers<[1], [0], [0], [1], [0, 0, 1, 1], [], []>} : vector<16x16xf32>, vector<16x16xf32>, vector<16x16xf32> -> vector<16x16xf32>
    %129 = tpu.reciprocal %127 {approx = true} : vector<16x1xf32> -> vector<16x1xf32>
    %130 = vector.broadcast %129 : vector<16x1xf32> to vector<16x16xf32>
    %131 = arith.mulf %128, %130 : vector<16x16xf32>
    %c16_50 = arith.constant 16 : index
    %c32_51 = arith.constant 32 : index
    %132 = vector.load %arg7[%c16_50, %c32_51] : memref<32x64xf32, #tpu.memory_space<vmem>>, vector<16x16xf32>
    tpu.vector_store %arg7[%c16_50, %c32_51], %131 {strides = array<i32>} : memref<32x64xf32, #tpu.memory_space<vmem>>, vector<16x16xf32>,
    %133 = vector.extract_strided_slice %6 {offsets = [16, 48], sizes = [16, 16], strides = [1, 1]} : vector<32x192xf32> to vector<16x16xf32>
    %134 = vector.extract_strided_slice %6 {offsets = [16, 112], sizes = [16, 16], strides = [1, 1]} : vector<32x192xf32> to vector<16x16xf32>
    %135 = vector.extract_strided_slice %6 {offsets = [16, 176], sizes = [16, 16], strides = [1, 1]} : vector<32x192xf32> to vector<16x16xf32>
    %cst_52 = arith.constant dense<0.000000e+00> : vector<16x16xf32>
    %136 = tpu.matmul %133, %134, %cst_52 {dimension_numbers = #tpu.dot_dimension_numbers<[1], [1], [0], [0], [0, 0, 1, 0], [], []>} : vector<16x16xf32>, vector<16x16xf32>, vector<16x16xf32> -> vector<16x16xf32>
    %cst_53 = arith.constant 2.500000e-01 : f32
    %137 = vector.broadcast %cst_53 : f32 to vector<16x16xf32>
    %138 = arith.mulf %136, %137 : vector<16x16xf32>
    %cst_54 = arith.constant dense<0xFF800000> : vector<16xf32>
    %139 = vector.multi_reduction <maximumf>, %138, %cst_54 [1] : vector<16x16xf32> to vector<16xf32>
    %140 = vector.shape_cast %139 : vector<16xf32> to vector<16x1xf32>
    %141 = vector.broadcast %140 : vector<16x1xf32> to vector<16x16xf32>
    %142 = arith.subf %138, %141 : vector<16x16xf32>
    %143 = math.exp %142 : vector<16x16xf32>
    %cst_55 = arith.constant dense<0.000000e+00> : vector<16xf32>
    %144 = vector.multi_reduction <add>, %143, %cst_55 [1] : vector<16x16xf32> to vector<16xf32>
    %145 = vector.shape_cast %144 : vector<16xf32> to vector<16x1xf32>
    %cst_56 = arith.constant dense<0.000000e+00> : vector<16x16xf32>
    %146 = tpu.matmul %143, %135, %cst_56 {dimension_numbers = #tpu.dot_dimension_numbers<[1], [0], [0], [1], [0, 0, 1, 1], [], []>} : vector<16x16xf32>, vector<16x16xf32>, vector<16x16xf32> -> vector<16x16xf32>
    %147 = tpu.reciprocal %145 {approx = true} : vector<16x1xf32> -> vector<16x1xf32>
    %148 = vector.broadcast %147 : vector<16x1xf32> to vector<16x16xf32>
    %149 = arith.mulf %146, %148 : vector<16x16xf32>
    %c16_57 = arith.constant 16 : index
    %c48_58 = arith.constant 48 : index
    %150 = vector.load %arg7[%c16_57, %c48_58] : memref<32x64xf32, #tpu.memory_space<vmem>>, vector<16x16xf32>
    tpu.vector_store %arg7[%c16_57, %c48_58], %149 {strides = array<i32>} : memref<32x64xf32, #tpu.memory_space<vmem>>, vector<16x16xf32>,
    %c0_59 = arith.constant 0 : index
    %c0_60 = arith.constant 0 : index
    %151 = vector.load %arg7[%c0_59, %c0_60] : memref<32x64xf32, #tpu.memory_space<vmem>>, vector<32x64xf32>
    %c0_61 = arith.constant 0 : index
    %c0_62 = arith.constant 0 : index
    %152 = vector.load %arg4[%c0_61, %c0_62] : memref<64x64xf32, #tpu.memory_space<vmem>>, vector<64x64xf32>
    %cst_63 = arith.constant dense<0.000000e+00> : vector<32x64xf32>
    %153 = tpu.matmul %151, %152, %cst_63 {dimension_numbers = #tpu.dot_dimension_numbers<[1], [0], [0], [1], [0, 0, 1, 1], [], []>} : vector<32x64xf32>, vector<64x64xf32>, vector<32x64xf32> -> vector<32x64xf32>
    %c0_64 = arith.constant 0 : index
    %c0_65 = arith.constant 0 : index
    %154 = vector.load %arg5[%c0_64, %c0_65] : memref<1x64xf32, #tpu.memory_space<vmem>>, vector<1x64xf32>
    %155 = vector.broadcast %154 : vector<1x64xf32> to vector<32x64xf32>
    %156 = arith.addf %153, %155 : vector<32x64xf32>
    %157 = vector.shape_cast %156 : vector<32x64xf32> to vector<2x16x64xf32>
    %c0_66 = arith.constant 0 : index
    %c0_67 = arith.constant 0 : index
    %c0_68 = arith.constant 0 : index
    %158 = vector.load %arg6[%c0_66, %c0_67, %c0_68] : memref<2x16x64xf32, #tpu.memory_space<vmem>>, vector<2x16x64xf32>
    tpu.vector_store %arg6[%c0_66, %c0_67, %c0_68], %157 {strides = array<i32>} : memref<2x16x64xf32, #tpu.memory_space<vmem>>, vector<2x16x64xf32>,
    return
  }
  func.func @transform_0(%arg0: i32) -> (i32, i32, i32) {
    %c0_i32 = arith.constant 0 : i32
    %c0_i32_0 = arith.constant 0 : i32
    %c0_i32_1 = arith.constant 0 : i32
    return %arg0, %c0_i32, %c0_i32_0 : i32, i32, i32
  }
  func.func @transform_1(%arg0: i32) -> (i32, i32) {
    %c0_i32 = arith.constant 0 : i32
    %c0_i32_0 = arith.constant 0 : i32
    %c0_i32_1 = arith.constant 0 : i32
    return %c0_i32, %c0_i32_0 : i32, i32
  }
  func.func @transform_2(%arg0: i32) -> (i32, i32) {
    %c0_i32 = arith.constant 0 : i32
    %c0_i32_0 = arith.constant 0 : i32
    %c0_i32_1 = arith.constant 0 : i32
    return %c0_i32, %c0_i32_0 : i32, i32
  }
  func.func @transform_3(%arg0: i32) -> (i32, i32) {
    %c0_i32 = arith.constant 0 : i32
    %c0_i32_0 = arith.constant 0 : i32
    %c0_i32_1 = arith.constant 0 : i32
    return %c0_i32, %c0_i32_0 : i32, i32
  }
  func.func @transform_4(%arg0: i32) -> (i32, i32) {
    %c0_i32 = arith.constant 0 : i32
    %c0_i32_0 = arith.constant 0 : i32
    %c0_i32_1 = arith.constant 0 : i32
    return %c0_i32, %c0_i32_0 : i32, i32
  }
  func.func @transform_5(%arg0: i32) -> (i32, i32, i32) {
    %c0_i32 = arith.constant 0 : i32
    %c0_i32_0 = arith.constant 0 : i32
    %c0_i32_1 = arith.constant 0 : i32
    return %arg0, %c0_i32, %c0_i32_0 : i32, i32, i32
  }
}

</mosaic_0001>

<bundles_post_ra>
// kernel: attention_forward.1
= control target key start
LH: loop header
LB: loop body
LE: loop exit
PB: predicated region body
PF: predicated region fallthrough
CT: control target
= control target key end

     0   :  { %10 = vsyncpa [#allocation4], 0  ;;  %s1817_s0 = inlined_call_operand.hbm [shape: f32[2,16,64], index: 0, kind: input, shape index: {}]   ;;  %s1818_s1 = inlined_call_operand.hbm [shape: f32[64,192], index: 1, kind: input, shape index: {}]   ;;  %s1819_s2 = inlined_call_operand.hbm [shape: f32[1,192], index: 2, kind: input, shape index: {}]   ;;  %s1820_s3 = inlined_call_operand.hbm [shape: f32[64,64], index: 3, kind: input, shape index: {}]   ;;  %s1821_s4 = inlined_call_operand.hbm [shape: f32[1,64], index: 4, kind: input, shape index: {}]   ;;  %s1822_s5 = inlined_call_operand.hbm [shape: f32[2,16,64], index: 5, kind: output, shape index: {}]  }
   0x1   :  { %11 = vsyncpa [#allocation7], 0 }
   0x2   :  { %12 = vsyncpa [#allocation10], 0  ;;  %s31_s20 = sshll.u32 %s1818_s1, 4  ;;  %s32_s20 = int_to_ptr.hbm [resolvable:$true] %s31_s20 }
   0x3   :  { %13 = vsyncpa [#allocation5], 0  ;;  %s1437_s21 = smov [#allocation6]   ;;  %s1438_s23 = smov 256  }
   0x4   :  { %s33_s22 = sshll.u32 %s1437_s21, 4  ;;  %s1439_s24 = smov 16   ;;  %s34_s22 = int_to_ptr.vmem [resolvable:$true] %s33_s22 }
   0x5   :  { %39 = dma.hbm_to_vmem [thread:$0]  %s32_s20, 2048, %s34_s22, [#allocation7], %s1438_s23, %s1438_s23, %s1439_s24  }
   0x6   :  { %s55_s27 = sshll.u32 %s1820_s3, 4  ;;  %s1440_s28 = smov [#allocation9]   ;;  %s56_s27 = int_to_ptr.hbm [resolvable:$true] %s55_s27 }
   0x7   :  { %s57_s29 = sshll.u32 %s1440_s28, 4  ;;  %s18_s1 = sshll.u32 %s1817_s0, 4  ;;  %s58_s29 = int_to_ptr.vmem [resolvable:$true] %s57_s29  ;;  %s19_s1 = int_to_ptr.hbm [resolvable:$true] %s18_s1 }
   0x8   :  { %s1441_s7 = smov 128   ;;  %s1442_s8 = smov 8  }
   0x9   :  { %63 = dma.hbm_to_vmem [thread:$0]  %s56_s27, 1024, %s58_s29, [#allocation10], %s1441_s7, %s1441_s7, %s1442_s8  }
   0xa   :  { %s45_s11 = sshll.u32 %s1819_s2, 4  ;;  %s1443_s3 = smov [#allocation3]   ;;  %s46_s11 = int_to_ptr.hbm [resolvable:$true] %s45_s11 }
   0xb   :  { %s20_s12 = sshll.u32 %s1443_s3, 4  ;;  %s1444_s0 = smov [#allocation8]   ;;  %s21_s12 = int_to_ptr.vmem [resolvable:$true] %s20_s12 }
   0xc   :  { %26 = dma.hbm_to_vmem [thread:$0]  %s19_s1, 512, %s21_s12, [#allocation4], %s1441_s7, %s1441_s7, %s1442_s8  }
   0xd   :  { %s47_s13 = sshll.u32 %s1444_s0, 4  ;;  %s69_s16 = sshll.u32 %s1821_s4, 4  ;;  %s48_s13 = int_to_ptr.vmem [resolvable:$true] %s47_s13  ;;  %s70_s16 = int_to_ptr.hbm [resolvable:$true] %s69_s16 }
   0xe   :  { %50 = dma.hbm_to_vmem [thread:$0]  %s46_s11, 32, %s48_s13, [#allocation7]  }
   0xf   :  { %s1445_s17 = smov [#allocation11]  }
  0x10   :  { %s71_s18 = sshll.u32 %s1445_s17, 4  ;;  %s72_s18 = int_to_ptr.vmem [resolvable:$true] %s71_s18 }
  0x11   :  { %74 = dma.hbm_to_vmem [thread:$0]  %s70_s16, 16, %s72_s18, [#allocation10]  }
  0x12   :  { %1429 = dma.done.wait [#allocation4], 512  }
  0x13   :  { %1430 = vsyncadd [#allocation4], 4294966784 }
  0x14   :  { %1431 = dma.done.wait [#allocation7], 2080  }
  0x15   :  { %1432 = vsyncadd [#allocation7], 4294965216 }
  0x16   :  { %1433 = dma.done.wait [#allocation10], 1040  }
  0x17   :  { %1434 = vsyncadd [#allocation10], 4294966256  ;;  %v113_v0 = vld [vmem:[#allocation6 + $0x70] sm:$0xff]  ;;  %v111_v1 = vld [vmem:[#allocation6 + $0x60] sm:$0xff]  ;;  %vm121_vm0 = vcmask 523264   ;;  %s1446_s2 = smov 112  }
  0x18   :  { %142 = vmatpush.msra.mxu0 %v113_v0  ;;  %v109_v2 = vld [vmem:[#allocation6 + $0x50] sm:$0xff]  ;;  %v107_v3 = vld [vmem:[#allocation6 + $0x40] sm:$0xff]  ;;  %v1509_v9 = vld [vmem:[#allocation3 + $0x8] sm:$0xff]  ;;  %s1447_s4 = smov 48   ;;  %s1448_s19 = smov 64   ;;  %vm198_vm1 = vcmask 130048  }
  0x19   :  { %v105_v4 = vld [vmem:[#allocation6 + $0x30] sm:$0xff]  ;;  %v103_v5 = vld [vmem:[#allocation6 + $0x20] sm:$0xff]  ;;  %v1517_v11 = vld [vmem:[#allocation3 + $0x18] sm:$0xff]  ;;  %s1449_s20 = smov 96   ;;  %s1450_s21 = smov 32   ;;  %vm393_vm2 = vcmask 261248  }
  0x1a   :  { %143 = vmatpush.msra.mxu0 %v111_v1  ;;  %v101_v6 = vld [vmem:[#allocation6 + $0x10] sm:$0xff]  ;;  %v99_v7 = vld [vmem:[#allocation6] sm:$0xff]  ;;  %s1451_s22 = smov 80   ;;  %v114_v22 = vld [vmem:[#allocation6 + $0x78] sm:$0xff]  ;;  %vm502_vm3 = vcmask 392448   ;;  %vm611_vm4 = vcmask 523648  }
  0x1b   :  { %v1505_v8 = vld [vmem:[#allocation3] sm:$0xff]  ;;  %v1513_v10 = vld [vmem:[#allocation3 + $0x10] sm:$0xff]  ;;  %v112_v23 = vld [vmem:[#allocation6 + $0x68] sm:$0xff]  ;;  %171 = vmatpush.msra.mxu1 %v114_v22  ;;  %s1452_s23 = smov [#allocation12]   ;;  %s1099_s27 = sshll.u32 %s1822_s5, 4  ;;  %s1100_s27 = int_to_ptr.hbm [resolvable:$true] %s1099_s27 }
  0x1c   :  { %144 = vmatpush.msra.mxu0 %v109_v2  ;;  %v1521_v12 = vld [vmem:[#allocation8] sm:$0x3]  ;;  %v110_v24 = vld [vmem:[#allocation6 + $0x58] sm:$0xff]  ;;  %v108_v25 = vld [vmem:[#allocation6 + $0x48] sm:$0xff] }
  0x1d   :  { %v117_v13 = vperm.slane %v1521_v12, 0  ;;  %172 = vmatpush.msra.mxu1 %v112_v23  ;;  %v106_v26 = vld [vmem:[#allocation6 + $0x38] sm:$0xff]  ;;  %v104_v27 = vld [vmem:[#allocation6 + $0x28] sm:$0xff]  ;;  %v1625_v55 = vperm.slane %v1521_v12, 1 }
  0x1e   :  { %145 = vmatpush.msra.mxu0 %v107_v3  ;;  %v102_v28 = vld [vmem:[#allocation6 + $0x18] sm:$0xff]  ;;  %v100_v29 = vld [vmem:[#allocation6 + $0x8] sm:$0xff] }
  0x1f   :  { %173 = vmatpush.msra.mxu1 %v110_v24 }
  0x20   :  { %146 = vmatpush.msra.mxu0 %v105_v4 }
  0x21   :  { %174 = vmatpush.msra.mxu1 %v108_v25 }
  0x22   :  { %147 = vmatpush.msra.mxu0 %v103_v5 }
  0x23   :  { %175 = vmatpush.msra.mxu1 %v106_v26 }
  0x24   :  { %148 = vmatpush.msra.mxu0 %v101_v6 }
  0x25   :  { %176 = vmatpush.msra.mxu1 %v104_v27 }
  0x26   :  { %149 = vmatpush.msra.mxu0 %v99_v7 }
  0x27   :  { %1114 = vmatmul.msk.f32.vlgmr.msra.gmra.mxu0 %vm121_vm0, %v1505_v8  ;;  %177 = vmatpush.msra.mxu1 %v102_v28 }
  0x29   :  { %178 = vmatpush.msra.mxu1 %v100_v29 }
  0x2a   :  { %1118 = vmatmul.msk.f32.vlgmr.msra.gmra.mxu1 %vm121_vm0, %v1505_v8 }
  0x2f   :  { %1115 = vmatmul.msk.f32.gmra.mxu0 %vm121_vm0, %v1509_v9 }
  0x32   :  { %1119 = vmatmul.msk.f32.gmra.mxu1 %vm121_vm0, %v1509_v9 }
  0x37   :  { %1116 = vmatmul.msk.f32.gmra.mxu0 %vm121_vm0, %v1513_v10 }
  0x3a   :  { %1120 = vmatmul.msk.f32.gmra.mxu1 %vm121_vm0, %v1513_v10 }
  0x3f   :  { %1117 = vmatmul.msk.f32.gmra.mxu0 %vm121_vm0, %v1517_v11 }
  0x42   :  { %1121 = vmatmul.msk.f32.gmra.mxu1 %vm121_vm0, %v1517_v11 }
  0xa4   :  { %v151_v14 = vpop.f32.mrf.mxu0 }
  0xa5   :  { %v1524_v15 = vadd.f32 %v151_v14, %v117_v13 }
  0xa7   :  { %285 = vrot.lane.b32.xlu2 %v1524_v15, %s1446_s2  ;;  %v180_v54 = vpop.f32.mrf.mxu1 }
  0xa8   :  { %v181_v59 = vadd.f32 %v180_v54, %v1625_v55 }
  0xac   :  { %v154_v16 = vpop.f32.mrf.mxu0 }
  0xad   :  { %v1528_v17 = vadd.f32 %v154_v16, %v117_v13 }
  0xaf   :  { %291 = vrot.lane.b32.xlu1 %v1528_v17, %s1447_s4  ;;  %196 = vrot.lane.b32.xlu0 %v1528_v17, %s1448_s19  ;;  %v183_v60 = vpop.f32.mrf.mxu1 }
  0xb0   :  { %287 = vrot.lane.b32.xlu2 %v1528_v17, %s1446_s2  ;;  %v184_v61 = vadd.f32 %v183_v60, %v1625_v55 }
  0xb2   :  { %v1190_v62 = vpack.i.bf16 %v181_v59, %v184_v61 }
  0xb4   :  { %v157_v18 = vpop.f32.mrf.mxu0 }
  0xb5   :  { %v1547_v21 = vadd.f32 %v157_v18, %v117_v13 }
  0xb7   :  { %289 = vrot.lane.b32.xlu1 %v1524_v15, %s1447_s4  ;;  %194 = vrot.lane.b32.xlu0 %v1524_v15, %s1448_s19 }
  0xb8   :  { %396 = vrot.lane.b32.xlu2 %v1524_v15, %s1449_s20 }
  0xbc   :  { %v160_v19 = vpop.f32.mrf.mxu0 }
  0xbd   :  { %v1540_v20 = vadd.f32 %v160_v19, %v117_v13 }
  0xbf   :  { %400 = vrot.lane.b32.xlu1 %v1524_v15, %s1450_s21  ;;  %402 = vrot.lane.b32.xlu0 %v1528_v17, %s1450_s21 }
  0xc0   :  { %618 = vrot.lane.b32.xlu2 %v1540_v20, %s1448_s19 }
  0xc7   :  { %398 = vrot.lane.b32.xlu1 %v1528_v17, %s1449_s20  ;;  %511 = vrot.lane.b32.xlu0 %v1528_v17, %s1439_s24 }
  0xc8   :  { %616 = vrot.lane.b32.xlu2 %v1547_v21, %s1448_s19 }
  0xcf   :  { %505 = vrot.lane.b32.xlu1 %v1524_v15, %s1451_s22  ;;  %509 = vrot.lane.b32.xlu0 %v1524_v15, %s1439_s24 }
  0xd0   :  { %822 = vrot.lane.b32.xlu2 %v1540_v20, %s1450_s21 }
  0xd7   :  { %712 = vrot.lane.b32.xlu1 %v1540_v20, %s1447_s4  ;;  %507 = vrot.lane.b32.xlu0 %v1528_v17, %s1451_s22 }
  0xd8   :  { %820 = vrot.lane.b32.xlu2 %v1547_v21, %s1450_s21 }
  0xdf   :  { %706 = vrot.lane.b32.xlu1 %v1547_v21, %s1446_s2  ;;  %710 = vrot.lane.b32.xlu0 %v1547_v21, %s1447_s4 }
  0xe0   :  { %930 = vrot.lane.b32.xlu2 %v1540_v20, %s1439_s24 }
  0xe7   :  { %708 = vrot.lane.b32.xlu1 %v1540_v20, %s1446_s2  ;;  %816 = vrot.lane.b32.xlu0 %v1547_v21, %s1449_s20 }
  0xe8   :  { %924 = vrot.lane.b32.xlu2 %v1547_v21, %s1451_s22 }
  0xef   :  { %928 = vrot.lane.b32.xlu1 %v1547_v21, %s1439_s24  ;;  %818 = vrot.lane.b32.xlu0 %v1540_v20, %s1449_s20 }
  0xf7   :  { %926 = vrot.lane.b32.xlu0 %v1540_v20, %s1451_s22  ;;  %1191 = vrot.lane.b32.xlu1 %v1190_v62, %s1446_s2 }
  0xff   :  { %1196 = vrot.lane.b32.xlu0 %v1190_v62, %s1449_s20 }
 0x101   :  { %v286_v30 = vpop.permute.xlu2 %285 }
 0x10a   :  { %v288_v31 = vpop.permute.xlu2 %287 }
 0x112   :  { %v397_v32 = vpop.permute.xlu2 %396 }
 0x11a   :  { %v619_v35 = vpop.permute.xlu2 %618 }
 0x121   :  { %v292_v33 = vpop.permute.xlu1 %291  ;;  %v197_v34 = vpop.permute.xlu0 %196 }
 0x122   :  { %1122 = vmatpush.xpose.msk.msra.mxu2 %vm198_vm1, %v197_v34  ;;  %1128 = vmatpush.xpose.msk.msra.mxu3 %vm198_vm1, %v292_v33  ;;  %v617_v38 = vpop.permute.xlu2 %616 }
 0x129   :  { %v290_v36 = vpop.permute.xlu1 %289  ;;  %v195_v37 = vpop.permute.xlu0 %194 }
 0x12a   :  { %1123 = vmatpush.xpose.msk.msra.mxu2 %vm198_vm1, %v195_v37  ;;  %1129 = vmatpush.xpose.msk.msra.mxu3 %vm198_vm1, %v290_v36  ;;  %v823_v41 = vpop.permute.xlu2 %822 }
 0x12d   :  { %1124 = vmatmul.msk.f32.vlgmr.msra.gmra.mxu2 %vm198_vm1, %v1524_v15  ;;  %1130 = vmatmul.msk.f32.vlgmr.msra.gmra.mxu3 %vm198_vm1, %v286_v30 }
 0x12e   :  { %270 = vmatpush.msrb.mxu2 %v184_v61 }
 0x130   :  { %271 = vmatpush.msrb.mxu2 %v181_v59 }
 0x131   :  { %v401_v39 = vpop.permute.xlu1 %400  ;;  %v403_v40 = vpop.permute.xlu0 %402 }
 0x132   :  { %1134 = vmatpush.xpose.msk.msrb.mxu3 %vm198_vm1, %v403_v40  ;;  %v821_v44 = vpop.permute.xlu2 %820 }
 0x135   :  { %1125 = vmatmul.msk.f32.gmra.mxu2 %vm198_vm1, %v1528_v17  ;;  %1131 = vmatmul.msk.f32.gmra.mxu3 %vm198_vm1, %v288_v31 }
 0x136   :  { %1135 = vmatpush.xpose.msk.msrb.mxu3 %vm198_vm1, %v401_v39 }
 0x139   :  { %v399_v42 = vpop.permute.xlu1 %398  ;;  %v512_v43 = vpop.permute.xlu0 %511 }
 0x13a   :  { %1146 = vmatpush.xpose.msk.msra.mxu3 %vm198_vm1, %v619_v35  ;;  %1140 = vmatpush.xpose.msk.msrb.mxu0 %vm198_vm1, %v512_v43  ;;  %v931_v51 = vpop.permute.xlu2 %930 }
 0x13d   :  { %1136 = vmatmul.msk.f32.vlgmr.msrb.gmra.mxu3 %vm198_vm1, %v397_v32 }
 0x13e   :  { %1147 = vmatpush.xpose.msk.msra.mxu3 %vm198_vm1, %v617_v38 }
 0x141   :  { %v506_v45 = vpop.permute.xlu1 %505  ;;  %v510_v46 = vpop.permute.xlu0 %509 }
 0x142   :  { %1158 = vmatpush.xpose.msk.msrb.mxu3 %vm198_vm1, %v823_v41  ;;  %1141 = vmatpush.xpose.msk.msrb.mxu0 %vm198_vm1, %v510_v46  ;;  %v925_v58 = vpop.permute.xlu2 %924 }
 0x145   :  { %1137 = vmatmul.msk.f32.gmra.mxu3 %vm198_vm1, %v399_v42  ;;  %1142 = vmatmul.msk.f32.vlgmr.msrb.gmra.mxu0 %vm198_vm1, %v506_v45 }
 0x146   :  { %1159 = vmatpush.xpose.msk.msrb.mxu3 %vm198_vm1, %v821_v44  ;;  %v186_v44 = vpop.f32.mrf.mxu1 }
 0x149   :  { %v713_v47 = vpop.permute.xlu1 %712  ;;  %v508_v48 = vpop.permute.xlu0 %507 }
 0x14a   :  { %1152 = vmatpush.xpose.msk.msra.mxu0 %vm198_vm1, %v713_v47 }
 0x14d   :  { %1143 = vmatmul.msk.f32.gmra.mxu0 %vm198_vm1, %v508_v48  ;;  %1148 = vmatmul.msk.f32.vlgmr.msra.gmra.mxu3 %vm198_vm1, %v1547_v21 }
 0x151   :  { %v707_v49 = vpop.permute.xlu1 %706  ;;  %v711_v50 = vpop.permute.xlu0 %710 }
 0x152   :  { %1153 = vmatpush.xpose.msk.msra.mxu0 %vm198_vm1, %v711_v50  ;;  %v189_v50 = vpop.f32.mrf.mxu1 }
 0x155   :  { %1149 = vmatmul.msk.f32.gmra.mxu3 %vm198_vm1, %v1540_v20  ;;  %1154 = vmatmul.msk.f32.vlgmr.msra.gmra.mxu0 %vm198_vm1, %v707_v49 }
 0x156   :  { %1164 = vmatpush.xpose.msk.msrb.mxu0 %vm198_vm1, %v931_v51  ;;  %v1697_v51 = vadd.f32 %v186_v44, %v1625_v55 }
 0x159   :  { %v709_v52 = vpop.permute.xlu1 %708  ;;  %v817_v53 = vpop.permute.xlu0 %816 }
 0x15d   :  { %1155 = vmatmul.msk.f32.gmra.mxu0 %vm198_vm1, %v709_v52  ;;  %1160 = vmatmul.msk.f32.vlgmr.msrb.gmra.mxu3 %vm198_vm1, %v817_v53  ;;  %v1700_v52 = vadd.f32 %v189_v50, %v1625_v55 }
 0x15f   :  { %v1215_v53 = vpack.i.bf16 %v1697_v51, %v1700_v52 }
 0x161   :  { %v929_v56 = vpop.permute.xlu1 %928  ;;  %v819_v57 = vpop.permute.xlu0 %818 }
 0x162   :  { %1165 = vmatpush.xpose.msk.msrb.mxu0 %vm198_vm1, %v929_v56 }
 0x165   :  { %1166 = vmatmul.msk.f32.vlgmr.msrb.gmra.mxu0 %vm198_vm1, %v925_v58  ;;  %1161 = vmatmul.msk.f32.gmra.mxu3 %vm198_vm1, %v819_v57 }
 0x169   :  { %v927_v63 = vpop.permute.xlu0 %926  ;;  %v1192_v30 = vpop.permute.xlu1 %1191 }
 0x16a   :  { %v1193_v31 = vunpack.i.l.bf16 %v1192_v30  ;;  %v1194_v32 = vunpack.i.h.bf16 %v1192_v30 }
 0x16c   :  { %372 = vmatpush.msra.mxu2 %v1193_v31 }
 0x16d   :  { %1167 = vmatmul.msk.f32.gmra.mxu0 %vm198_vm1, %v927_v63 }
 0x16e   :  { %373 = vmatpush.msra.mxu2 %v1194_v32 }
 0x171   :  { %v1197_v58 = vpop.permute.xlu0 %1196 }
 0x172   :  { %v1198_v60 = vunpack.i.l.bf16 %v1197_v58  ;;  %v1199_v55 = vunpack.i.h.bf16 %v1197_v58 }
 0x1b0   :  { %v224_v0 = vpop.f32.mrf.mxu2  ;;  %v318_v1 = vpop.f32.mrf.mxu3 }
 0x1b1   :  { %v1635_v2 = vmul.f32 0.25, %v224_v0  ;;  %v1643_v10 = vmul.f32 0.25, %v318_v1 }
 0x1b3   :  { %v232_v3 = vsel %vm198_vm1, %v1635_v2, -inf  ;;  %v326_v13 = vsel %vm198_vm1, %v1643_v10, -inf }
 0x1b4   :  { %233 = vmax.xlane.f32.xlu1 %v232_v3 }
 0x1b8   :  { %v321_v4 = vpop.f32.mrf.mxu3  ;;  %v227_v15 = vpop.f32.mrf.mxu2 }
 0x1b9   :  { %v1652_v17 = vmul.f32 0.25, %v227_v15  ;;  %v1656_v21 = vmul.f32 0.25, %v321_v4 }
 0x1bb   :  { %v235_v19 = vsel %vm198_vm1, %v1652_v17, -inf  ;;  %v329_v25 = vsel %vm198_vm1, %v1656_v21, -inf }
 0x1c0   :  { %v429_v5 = vpop.f32.mrf.mxu3 }
 0x1c1   :  { %v1664_v26 = vmul.f32 0.25, %v429_v5 }
 0x1c2   :  { %v538_v6 = vpop.f32.mrf.mxu0 }
 0x1c3   :  { %v1639_v7 = vmul.f32 0.25, %v538_v6  ;;  %v437_v29 = vsel %vm198_vm1, %v1664_v26, -inf }
 0x1c5   :  { %v546_v8 = vsel %vm198_vm1, %v1639_v7, -inf }
 0x1c6   :  { %547 = vmax.xlane.f32.xlu0 %v546_v8 }
 0x1c8   :  { %v432_v9 = vpop.f32.mrf.mxu3 }
 0x1c9   :  { %v1676_v39 = vmul.f32 0.25, %v432_v9 }
 0x1ca   :  { %v541_v11 = vpop.f32.mrf.mxu0 }
 0x1cb   :  { %v1645_v12 = vmul.f32 0.25, %v541_v11  ;;  %v440_v42 = vsel %vm198_vm1, %v1676_v39, -inf }
 0x1cd   :  { %1201 = vrot.lane.b32.xlu1 %v1190_v62, %s1451_s22  ;;  %v549_v14 = vsel %vm198_vm1, %v1645_v12, -inf }
 0x1ce   :  { %327 = vmax.xlane.f32.xlu0 %v326_v13  ;;  %550 = vmax.xlane.f32.xlu2 %v549_v14 }
 0x1d0   :  { %v645_v16 = vpop.f32.mrf.mxu3 }
 0x1d1   :  { %v1688_v46 = vmul.f32 0.25, %v645_v16 }
 0x1d2   :  { %v739_v18 = vpop.f32.mrf.mxu0 }
 0x1d3   :  { %v1680_v41 = vmul.f32 0.25, %v739_v18  ;;  %v653_v48 = vsel %vm198_vm1, %v1688_v46, -inf }
 0x1d5   :  { %v747_v45 = vsel %vm198_vm1, %v1680_v41, -inf }
 0x1d6   :  { %236 = vmax.xlane.f32.xlu2 %v235_v19 }
 0x1d8   :  { %v648_v20 = vpop.f32.mrf.mxu3 }
 0x1d9   :  { %v1658_v22 = vmul.f32 0.25, %v648_v20 }
 0x1da   :  { %v742_v23 = vpop.f32.mrf.mxu0 }
 0x1db   :  { %v656_v24 = vsel %vm198_vm1, %v1658_v22, -inf  ;;  %v1668_v33 = vmul.f32 0.25, %v742_v23 }
 0x1dc   :  { %657 = vmax.xlane.f32.xlu0 %v656_v24 }
 0x1dd   :  { %v750_v36 = vsel %vm198_vm1, %v1668_v33, -inf }
 0x1de   :  { %330 = vmax.xlane.f32.xlu2 %v329_v25 }
 0x1e0   :  { %v849_v28 = vpop.f32.mrf.mxu3 }
 0x1e1   :  { %v1709_v62 = vmul.f32 0.25, %v849_v28 }
 0x1e2   :  { %v957_v27 = vpop.f32.mrf.mxu0 }
 0x1e3   :  { %v1690_v47 = vmul.f32 0.25, %v957_v27  ;;  %v857_v1 = vsel %vm198_vm1, %v1709_v62, -inf }
 0x1e5   :  { %v965_v49 = vsel %vm198_vm1, %v1690_v47, -inf }
 0x1e6   :  { %438 = vmax.xlane.f32.xlu2 %v437_v29 }
 0x1e8   :  { %v852_v38 = vpop.f32.mrf.mxu3 }
 0x1e9   :  { %v1678_v40 = vmul.f32 0.25, %v852_v38 }
 0x1ea   :  { %v960_v34 = vpop.f32.mrf.mxu0 }
 0x1eb   :  { %v1670_v35 = vmul.f32 0.25, %v960_v34  ;;  %v860_v43 = vsel %vm198_vm1, %v1678_v40, -inf }
 0x1ed   :  { %v968_v37 = vsel %vm198_vm1, %v1670_v35, -inf }
 0x1ee   :  { %751 = vmax.xlane.f32.xlu2 %v750_v36  ;;  %969 = vmax.xlane.f32.xlu0 %v968_v37 }
 0x1f6   :  { %441 = vmax.xlane.f32.xlu2 %v440_v42  ;;  %861 = vmax.xlane.f32.xlu0 %v860_v43 }
 0x1f7   :  { %748 = vmax.xlane.f32.xlu1 %v747_v45 }
 0x1fe   :  { %654 = vmax.xlane.f32.xlu2 %v653_v48 }
 0x1ff   :  { %966 = vmax.xlane.f32.xlu1 %v965_v49 }
 0x20a   :  { %1216 = vrot.lane.b32.xlu0 %v1215_v53, %s1451_s22 }
 0x216   :  { %1206 = vrot.lane.b32.xlu2 %v1215_v53, %s1446_s2 }
 0x218   :  { %1211 = vrot.lane.b32.xlu1 %v1215_v53, %s1449_s20 }
 0x227   :  { %v234_v54 = vpop.xlane.xlu1 %233 }
 0x228   :  { %v238_v56 = vsub.f32 %v1635_v2, %v234_v54 }
 0x22a   :  { %v240_v57 = vmul.f32 1.442695, %v238_v56 }
 0x22c   :  { %1221 = vpow2.f32 %v240_v57 }
 0x232   :  { %v1222_v59 = vpop.eup %1221 }
 0x233   :  { %1126 = vmatmul.msk.f32.vlgmr.msrb.gmra.mxu2 %vm198_vm1, %v1222_v59  ;;  %v244_v20 = vsel %vm198_vm1, %v1222_v59, 0.0 }
 0x234   :  { %481 = vmatpush.msrb.mxu2 %v1198_v60 }
 0x236   :  { %482 = vmatpush.msrb.mxu2 %v1199_v55 }
 0x239   :  { %v548_v61 = vpop.xlane.xlu0 %547 }
 0x23a   :  { %v552_v63 = vsub.f32 %v1639_v7, %v548_v61 }
 0x23c   :  { %v554_v0 = vmul.f32 1.442695, %v552_v63 }
 0x23e   :  { %1223 = vpow2.f32 %v554_v0 }
 0x23f   :  { %v1202_v2 = vpop.permute.xlu1 %1201  ;;  %858 = vmax.xlane.f32.xlu2 %v857_v1 }
 0x240   :  { %v1203_v3 = vunpack.i.l.bf16 %v1202_v2  ;;  %v1204_v9 = vunpack.i.h.bf16 %v1202_v2 }
 0x241   :  { %v551_v4 = vpop.xlane.xlu2 %550  ;;  %v328_v5 = vpop.xlane.xlu0 %327 }
 0x242   :  { %v553_v6 = vsub.f32 %v1645_v12, %v551_v4  ;;  %v332_v8 = vsub.f32 %v1643_v10, %v328_v5  ;;  %590 = vmatpush.msrb.mxu1 %v1203_v3 }
 0x244   :  { %v1224_v11 = vpop.eup %1223  ;;  %v556_v13 = vmul.f32 1.442695, %v553_v6  ;;  %v334_v14 = vmul.f32 1.442695, %v332_v8  ;;  %591 = vmatpush.msrb.mxu1 %v1204_v9 }
 0x245   :  { %1144 = vmatmul.msk.f32.vlgmr.msrb.gmra.mxu1 %vm198_vm1, %v1224_v11  ;;  %v558_v7 = vsel %vm198_vm1, %v1224_v11, 0.0 }
 0x246   :  { %1225 = vpow2.f32 %v556_v13  ;;  %559 = vadd.xlane.f32.xlu0 %v558_v7 }
 0x247   :  { %1227 = vpow2.f32 %v334_v14 }
 0x249   :  { %v237_v15 = vpop.xlane.xlu2 %236 }
 0x24a   :  { %v239_v16 = vsub.f32 %v1652_v17, %v237_v15 }
 0x24c   :  { %v1226_v18 = vpop.eup %1225  ;;  %v242_v12 = vmul.f32 1.442695, %v239_v16 }
 0x24d   :  { %v1228_v19 = vpop.eup %1227  ;;  %1145 = vmatmul.msk.f32.gmra.mxu1 %vm198_vm1, %v1226_v18  ;;  %v561_v10 = vsel %vm198_vm1, %v1226_v18, 0.0 }
 0x24e   :  { %1229 = vpow2.f32 %v242_v12  ;;  %562 = vadd.xlane.f32.xlu2 %v561_v10  ;;  %245 = vadd.xlane.f32.xlu0 %v244_v20  ;;  %v338_v23 = vsel %vm198_vm1, %v1228_v19, 0.0 }
 0x24f   :  { %339 = vadd.xlane.f32.xlu1 %v338_v23  ;;  %v658_v36 = vpop.xlane.xlu0 %657 }
 0x251   :  { %v331_v24 = vpop.xlane.xlu2 %330 }
 0x252   :  { %v333_v25 = vsub.f32 %v1656_v21, %v331_v24 }
 0x254   :  { %v1230_v27 = vpop.eup %1229  ;;  %v336_v17 = vmul.f32 1.442695, %v333_v25 }
 0x255   :  { %1127 = vmatmul.msk.f32.gmra.mxu2 %vm198_vm1, %v1230_v27  ;;  %v247_v28 = vsel %vm198_vm1, %v1230_v27, 0.0 }
 0x256   :  { %1231 = vpow2.f32 %v336_v17 }
 0x257   :  { %248 = vadd.xlane.f32.xlu1 %v247_v28 }
 0x259   :  { %v439_v29 = vpop.xlane.xlu2 %438 }
 0x25a   :  { %v443_v31 = vsub.f32 %v1664_v26, %v439_v29 }
 0x25c   :  { %v1232_v30 = vpop.eup %1231  ;;  %v445_v21 = vmul.f32 1.442695, %v443_v31 }
 0x25d   :  { %1132 = vmatmul.msk.f32.vlgmr.msra.gmra.mxu2 %vm198_vm1, %v1228_v19  ;;  %v341_v32 = vsel %vm198_vm1, %v1232_v30, 0.0 }
 0x25e   :  { %691 = vmatpush.msra.mxu2 %v1700_v52  ;;  %342 = vadd.xlane.f32.xlu2 %v341_v32  ;;  %1233 = vpow2.f32 %v445_v21 }
 0x260   :  { %692 = vmatpush.msra.mxu2 %v1697_v51 }
 0x261   :  { %v752_v34 = vpop.xlane.xlu2 %751  ;;  %v970_v42 = vpop.xlane.xlu0 %969 }
 0x262   :  { %v754_v37 = vsub.f32 %v1668_v33, %v752_v34  ;;  %v972_v6 = vsub.f32 %v1670_v35, %v970_v42 }
 0x264   :  { %v757_v38 = vmul.f32 1.442695, %v754_v37  ;;  %v1234_v45 = vpop.eup %1233  ;;  %v975_v8 = vmul.f32 1.442695, %v972_v6 }
 0x265   :  { %1133 = vmatmul.msk.f32.gmra.mxu2 %vm198_vm1, %v1232_v30  ;;  %v449_v3 = vsel %vm198_vm1, %v1234_v45, 0.0 }
 0x266   :  { %1235 = vpow2.f32 %v757_v38 }
 0x269   :  { %v442_v26 = vpop.xlane.xlu2 %441  ;;  %v862_v56 = vpop.xlane.xlu0 %861 }
 0x26a   :  { %v444_v43 = vsub.f32 %v1676_v39, %v442_v26  ;;  %v749_v44 = vpop.xlane.xlu1 %748  ;;  %v864_v12 = vsub.f32 %v1678_v40, %v862_v56 }
 0x26b   :  { %v753_v48 = vsub.f32 %v1680_v41, %v749_v44  ;;  %v660_v41 = vsub.f32 %v1658_v22, %v658_v36 }
 0x26c   :  { %v1236_v49 = vpop.eup %1235  ;;  %v447_v50 = vmul.f32 1.442695, %v444_v43  ;;  %v867_v10 = vmul.f32 1.442695, %v864_v12 }
 0x26d   :  { %v755_v51 = vmul.f32 1.442695, %v753_v48  ;;  %1138 = vmatmul.msk.f32.vlgmr.msrb.gmra.mxu2 %vm198_vm1, %v1234_v45  ;;  %v762_v33 = vsel %vm198_vm1, %v1236_v49, 0.0  ;;  %v663_v60 = vmul.f32 1.442695, %v660_v41 }
 0x26e   :  { %1237 = vpow2.f32 %v447_v50  ;;  %763 = vadd.xlane.f32.xlu0 %v762_v33 }
 0x26f   :  { %1239 = vpow2.f32 %v755_v51 }
 0x271   :  { %v655_v52 = vpop.xlane.xlu2 %654 }
 0x272   :  { %v659_v53 = vsub.f32 %v1688_v46, %v655_v52  ;;  %v967_v61 = vpop.xlane.xlu1 %966 }
 0x273   :  { %v971_v22 = vsub.f32 %v1690_v47, %v967_v61 }
 0x274   :  { %v1238_v54 = vpop.eup %1237  ;;  %v661_v39 = vmul.f32 1.442695, %v659_v53 }
 0x275   :  { %1139 = vmatmul.msk.f32.gmra.mxu2 %vm198_vm1, %v1238_v54  ;;  %v1240_v57 = vpop.eup %1239  ;;  %v973_v4 = vmul.f32 1.442695, %v971_v22  ;;  %v452_v47 = vsel %vm198_vm1, %v1238_v54, 0.0 }
 0x276   :  { %1241 = vpow2.f32 %v661_v39  ;;  %v759_v58 = vsel %vm198_vm1, %v1240_v57, 0.0 }
 0x277   :  { %760 = vadd.xlane.f32.xlu2 %v759_v58  ;;  %1243 = vpow2.f32 %v663_v60 }
 0x278   :  { %1245 = vpow2.f32 %v973_v4 }
 0x279   :  { %v1207_v59 = vpop.permute.xlu2 %1206  ;;  %1247 = vpow2.f32 %v975_v8 }
 0x27a   :  { %v1208_v55 = vunpack.i.l.bf16 %v1207_v59  ;;  %v1209_v0 = vunpack.i.h.bf16 %v1207_v59 }
 0x27c   :  { %v1741_v63 = vpop.eup %1241  ;;  %793 = vmatpush.msra.mxu1 %v1208_v55  ;;  %v1217_v46 = vpop.permute.xlu0 %1216 }
 0x27d   :  { %1150 = vmatmul.msk.f32.vlgmr.msra.gmra.mxu2 %vm198_vm1, %v1741_v63  ;;  %v1218_v1 = vunpack.i.l.bf16 %v1217_v46  ;;  %v1219_v2 = vunpack.i.h.bf16 %v1217_v46  ;;  %v1748_v5 = vpop.eup %1243 }
 0x27e   :  { %794 = vmatpush.msra.mxu1 %v1209_v0  ;;  %v1246_v13 = vpop.eup %1245  ;;  %v668_v4 = vsel %vm198_vm1, %v1748_v5, 0.0 }
 0x27f   :  { %1156 = vmatmul.msk.f32.vlgmr.msra.gmra.mxu1 %vm198_vm1, %v1240_v57  ;;  %450 = vadd.xlane.f32.xlu2 %v449_v3  ;;  %v977_v7 = vsel %vm198_vm1, %v1246_v13, 0.0  ;;  %v1248_v35 = vpop.eup %1247  ;;  %v665_v3 = vsel %vm198_vm1, %v1741_v63, 0.0 }
 0x280   :  { %1009 = vmatpush.msrb.mxu1 %v1218_v1  ;;  %v980_v15 = vsel %vm198_vm1, %v1248_v35, 0.0 }
 0x282   :  { %1010 = vmatpush.msrb.mxu1 %v1219_v2 }
 0x285   :  { %1151 = vmatmul.msk.f32.gmra.mxu2 %vm198_vm1, %v1748_v5 }
 0x287   :  { %1157 = vmatmul.msk.f32.gmra.mxu1 %vm198_vm1, %v1236_v49  ;;  %453 = vadd.xlane.f32.xlu2 %v452_v47 }
 0x28a   :  { %v1212_v9 = vpop.permute.xlu1 %1211 }
 0x28b   :  { %v1213_v11 = vunpack.i.l.bf16 %v1212_v9  ;;  %v1214_v14 = vunpack.i.h.bf16 %v1212_v9 }
 0x28d   :  { %901 = vmatpush.msrb.mxu2 %v1213_v11  ;;  %v1043_v11 = vld [vmem:[#allocation9 + $0x38] sm:$0xff] }
 0x28e   :  { %1068 = vmatpush.msra.mxu3 %v1043_v11 }
 0x28f   :  { %1168 = vmatmul.msk.f32.vlgmr.msrb.gmra.mxu1 %vm198_vm1, %v1246_v13  ;;  %902 = vmatpush.msrb.mxu2 %v1214_v14 }
 0x290   :  { %978 = vadd.xlane.f32.xlu2 %v977_v7 }
 0x297   :  { %1169 = vmatmul.msk.f32.gmra.mxu1 %vm198_vm1, %v1248_v35 }
 0x298   :  { %981 = vadd.xlane.f32.xlu2 %v980_v15 }
 0x2b2   :  { %v859_v16 = vpop.xlane.xlu2 %858 }
 0x2b3   :  { %v863_v18 = vsub.f32 %v1709_v62, %v859_v16 }
 0x2b5   :  { %v865_v19 = vmul.f32 1.442695, %v863_v18 }
 0x2b6   :  { %v273_v28 = vpop.f32.mrf.mxu2 }
 0x2b7   :  { %1249 = vpow2.f32 %v865_v19  ;;  %v1042_v19 = vld [vmem:[#allocation9 + $0x30] sm:$0xff] }
 0x2b8   :  { %1251 = vpow2.f32 %v867_v10  ;;  %1069 = vmatpush.msra.mxu3 %v1042_v19 }
 0x2b9   :  { %v560_v20 = vpop.xlane.xlu0 %559 }
 0x2bd   :  { %v1250_v23 = vpop.eup %1249 }
 0x2be   :  { %1162 = vmatmul.msk.f32.vlgmr.msrb.gmra.mxu2 %vm198_vm1, %v1250_v23  ;;  %v869_v24 = vsel %vm198_vm1, %v1250_v23, 0.0  ;;  %v1252_v27 = vpop.eup %1251  ;;  %v1041_v23 = vld [vmem:[#allocation9 + $0x28] sm:$0xff] }
 0x2bf   :  { %870 = vadd.xlane.f32.xlu1 %v869_v24  ;;  %v872_v62 = vsel %vm198_vm1, %v1252_v27, 0.0  ;;  %1070 = vmatpush.msra.mxu3 %v1041_v23 }
 0x2c1   :  { %v246_v25 = vpop.xlane.xlu0 %245  ;;  %v563_v31 = vpop.xlane.xlu2 %562 }
 0x2c2   :  { %1253 = vrcp.f32 %v246_v25  ;;  %v340_v17 = vpop.xlane.xlu1 %339  ;;  %v593_v36 = vpop.f32.mrf.mxu1  ;;  %v1040_v25 = vld [vmem:[#allocation9 + $0x20] sm:$0xff] }
 0x2c3   :  { %1071 = vmatpush.msra.mxu3 %v1040_v25 }
 0x2c6   :  { %1163 = vmatmul.msk.f32.gmra.mxu2 %vm198_vm1, %v1252_v27 }
 0x2c7   :  { %873 = vadd.xlane.f32.xlu1 %v872_v62 }
 0x2c8   :  { %v1254_v40 = vpop.eup %1253 }
 0x2c9   :  { %v281_v29 = vmul.f32 %v1254_v40, %v273_v28  ;;  %v1038_v40 = vld [vmem:[#allocation9 + $0x10] sm:$0xff]  ;;  %v1037_v28 = vld [vmem:[#allocation9 + $0x8] sm:$0xff] }
 0x2ca   :  { %v249_v30 = vpop.xlane.xlu1 %248  ;;  %v596_v51 = vpop.f32.mrf.mxu1 }
 0x2cb   :  { %283 = vst.msk [vmem:[#allocation2] sm:$0xff] %vm198_vm1, %v281_v29  ;;  %1255 = vrcp.f32 %v249_v30  ;;  %v1036_v29 = vld [vmem:[#allocation9] sm:$0xff] }
 0x2cc   :  { %1257 = vrcp.f32 %v560_v20 }
 0x2cd   :  { %1259 = vrcp.f32 %v340_v17  ;;  %v1039_v17 = vld [vmem:[#allocation9 + $0x18] sm:$0xff] }
 0x2ce   :  { %1072 = vmatpush.msra.mxu3 %v1039_v17 }
 0x2d0   :  { %1073 = vmatpush.msra.mxu3 %v1038_v40 }
 0x2d1   :  { %v1256_v32 = vpop.eup %1255  ;;  %v343_v26 = vpop.xlane.xlu2 %342 }
 0x2d2   :  { %v1258_v37 = vpop.eup %1257  ;;  %1261 = vrcp.f32 %v343_v26  ;;  %1074 = vmatpush.msra.mxu3 %v1037_v28 }
 0x2d3   :  { %v601_v38 = vmul.f32 %v1258_v37, %v593_v36  ;;  %v1260_v42 = vpop.eup %1259  ;;  %1263 = vrcp.f32 %v563_v31 }
 0x2d4   :  { %1075 = vmatpush.msra.mxu3 %v1036_v29 }
 0x2d8   :  { %v276_v21 = vpop.f32.mrf.mxu2  ;;  %v1262_v45 = vpop.eup %1261 }
 0x2d9   :  { %v282_v34 = vmul.f32 %v1256_v32, %v276_v21  ;;  %v1264_v33 = vpop.eup %1263 }
 0x2da   :  { %v602_v52 = vmul.f32 %v1264_v33, %v596_v51 }
 0x2db   :  { %284 = vst.msk [vmem:[#allocation2 + $0x8] sm:$0xff] %vm198_vm1, %v282_v34 }
 0x2e0   :  { %v375_v43 = vpop.f32.mrf.mxu2  ;;  %605 = vrot.lane.b32.xlu1 %v601_v38, %s1447_s4 }
 0x2e1   :  { %v383_v44 = vmul.f32 %v1260_v42, %v375_v43  ;;  %v764_v14 = vpop.xlane.xlu0 %763 }
 0x2e3   :  { %387 = vrot.lane.b32.xlu2 %v383_v44, %s1439_s24 }
 0x2e8   :  { %v378_v48 = vpop.f32.mrf.mxu2 }
 0x2e9   :  { %v384_v49 = vmul.f32 %v1262_v45, %v378_v48 }
 0x2ea   :  { %v761_v50 = vpop.xlane.xlu2 %760 }
 0x2eb   :  { %389 = vrot.lane.b32.xlu2 %v384_v49, %s1439_s24 }
 0x2f0   :  { %v484_v54 = vpop.f32.mrf.mxu2 }
 0x2f2   :  { %v451_v53 = vpop.xlane.xlu2 %450 }
 0x2f3   :  { %607 = vrot.lane.b32.xlu2 %v602_v52, %s1447_s4  ;;  %1265 = vrcp.f32 %v451_v53 }
 0x2f4   :  { %1267 = vrcp.f32 %v761_v50 }
 0x2f8   :  { %v487_v55 = vpop.f32.mrf.mxu2 }
 0x2f9   :  { %v1266_v56 = vpop.eup %1265 }
 0x2fa   :  { %v454_v39 = vpop.xlane.xlu2 %453  ;;  %v492_v57 = vmul.f32 %v1266_v56, %v484_v54  ;;  %v1268_v41 = vpop.eup %1267  ;;  %v1220_v54 = vld [vmem:[#allocation11] ss:$0 sm:$0xff] }
 0x2fb   :  { %1269 = vrcp.f32 %v454_v39 }
 0x2fc   :  { %v796_v58 = vpop.f32.mrf.mxu1  ;;  %496 = vrot.lane.b32.xlu0 %v492_v57, %s1450_s21 }
 0x2fd   :  { %v804_v59 = vmul.f32 %v1268_v41, %v796_v58 }
 0x2ff   :  { %808 = vrot.lane.b32.xlu2 %v804_v59, %s1439_s24 }
 0x300   :  { %v1779_v6 = vpop.f32.mrf.mxu2 }
 0x301   :  { %v1270_v60 = vpop.eup %1269 }
 0x302   :  { %v493_v0 = vmul.f32 %v1270_v60, %v487_v55 }
 0x303   :  { %v979_v61 = vpop.xlane.xlu2 %978 }
 0x304   :  { %v799_v46 = vpop.f32.mrf.mxu1  ;;  %498 = vrot.lane.b32.xlu1 %v493_v0, %s1450_s21  ;;  %1271 = vrcp.f32 %v979_v61 }
 0x308   :  { %v1781_v9 = vpop.f32.mrf.mxu2 }
 0x30a   :  { %v1272_v1 = vpop.eup %1271 }
 0x30b   :  { %v982_v47 = vpop.xlane.xlu2 %981 }
 0x30c   :  { %v1012_v22 = vpop.f32.mrf.mxu1 }
 0x30d   :  { %v1020_v2 = vmul.f32 %v1272_v1, %v1012_v22 }
 0x30f   :  { %1024 = vrot.lane.b32.xlu2 %v1020_v2, %s1447_s4 }
 0x314   :  { %v1015_v24 = vpop.f32.mrf.mxu1 }
 0x326   :  { %666 = vadd.xlane.f32.xlu0 %v665_v3 }
 0x32e   :  { %669 = vadd.xlane.f32.xlu1 %v668_v4 }
 0x332   :  { %v871_v8 = vpop.xlane.xlu1 %870 }
 0x333   :  { %1273 = vrcp.f32 %v871_v8 }
 0x334   :  { %1275 = vrcp.f32 %v764_v14 }
 0x339   :  { %v1274_v7 = vpop.eup %1273 }
 0x33a   :  { %v874_v63 = vpop.xlane.xlu1 %873  ;;  %v1276_v16 = vpop.eup %1275 }
 0x33b   :  { %1277 = vrcp.f32 %v874_v63  ;;  %v805_v10 = vmul.f32 %v1276_v16, %v799_v46 }
 0x33c   :  { %1279 = vrcp.f32 %v982_v47 }
 0x33d   :  { %v388_v13 = vpop.permute.xlu2 %387 }
 0x33e   :  { %394 = vst.msk [vmem:[#allocation2] sm:$0xff] %vm393_vm2, %v388_v13 }
 0x341   :  { %v904_v35 = vpop.f32.mrf.mxu2  ;;  %v1278_v18 = vpop.eup %1277 }
 0x342   :  { %v912_v5 = vmul.f32 %v1274_v7, %v904_v35  ;;  %v1280_v27 = vpop.eup %1279 }
 0x343   :  { %v1021_v62 = vmul.f32 %v1280_v27, %v1015_v24 }
 0x344   :  { %916 = vrot.lane.b32.xlu2 %v912_v5, %s1450_s21 }
 0x345   :  { %v390_v15 = vpop.permute.xlu2 %389 }
 0x346   :  { %395 = vst.msk [vmem:[#allocation2 + $0x8] sm:$0xff] %vm393_vm2, %v390_v15 }
 0x349   :  { %v907_v12 = vpop.f32.mrf.mxu2 }
 0x34a   :  { %v913_v20 = vmul.f32 %v1278_v18, %v907_v12 }
 0x34c   :  { %810 = vrot.lane.b32.xlu2 %v805_v10, %s1439_s24  ;;  %918 = vrot.lane.b32.xlu0 %v913_v20, %s1450_s21  ;;  %s1097_s24 = sshll.u32 %s1452_s23, 4  ;;  %s1098_s24 = int_to_ptr.vmem [resolvable:$true] %s1097_s24 }
 0x34d   :  { %v608_v21 = vpop.permute.xlu2 %607 }
 0x352   :  { %v606_v30 = vpop.permute.xlu1 %605 }
 0x354   :  { %1026 = vrot.lane.b32.xlu2 %v1021_v62, %s1447_s4 }
 0x359   :  { %v809_v37 = vpop.permute.xlu2 %808 }
 0x369   :  { %v1025_v38 = vpop.permute.xlu2 %1024 }
 0x36e   :  { %v497_v31 = vpop.permute.xlu0 %496 }
 0x36f   :  { %503 = vst.msk [vmem:[#allocation2] sm:$0xff] %vm502_vm3, %v497_v31 }
 0x370   :  { %612 = vst.msk [vmem:[#allocation2] sm:$0xff] %vm611_vm4, %v606_v30 }
 0x376   :  { %v499_v32 = vpop.permute.xlu1 %498 }
 0x377   :  { %504 = vst.msk [vmem:[#allocation2 + $0x8] sm:$0xff] %vm502_vm3, %v499_v32  ;;  %v1032_v34 = vld [vmem:[#allocation2] sm:$0xff] }
 0x378   :  { %613 = vst.msk [vmem:[#allocation2 + $0x8] sm:$0xff] %vm611_vm4, %v608_v21  ;;  %1170 = vmatmul.msk.f32.vlgmr.msra.gmra.mxu3 %vm121_vm0, %v1032_v34 }
 0x37f   :  { %v1033_v36 = vld [vmem:[#allocation2 + $0x8] sm:$0xff] }
 0x380   :  { %1171 = vmatmul.msk.f32.gmra.mxu3 %vm121_vm0, %v1033_v36 }
 0x399   :  { %v667_v26 = vpop.xlane.xlu0 %666 }
 0x39a   :  { %1281 = vrcp.f32 %v667_v26 }
 0x39e   :  { %v917_v44 = vpop.permute.xlu2 %916 }
 0x3a0   :  { %v1282_v42 = vpop.eup %1281 }
 0x3a1   :  { %v702_v43 = vmul.f32 %v1282_v42, %v1779_v6  ;;  %v670_v45 = vpop.xlane.xlu1 %669 }
 0x3a2   :  { %1283 = vrcp.f32 %v670_v45 }
 0x3a3   :  { %704 = vst.msk [vmem:[#allocation2 + $0x10] sm:$0xff] %vm198_vm1, %v702_v43 }
 0x3a4   :  { %814 = vst.msk [vmem:[#allocation2 + $0x10] sm:$0xff] %vm393_vm2, %v809_v37 }
 0x3a5   :  { %922 = vst.msk [vmem:[#allocation2 + $0x10] sm:$0xff] %vm502_vm3, %v917_v44 }
 0x3a6   :  { %1030 = vst.msk [vmem:[#allocation2 + $0x10] sm:$0xff] %vm611_vm4, %v1025_v38  ;;  %v811_v50 = vpop.permute.xlu2 %810 }
 0x3a8   :  { %v1284_v48 = vpop.eup %1283 }
 0x3a9   :  { %v703_v49 = vmul.f32 %v1284_v48, %v1781_v9 }
 0x3ab   :  { %705 = vst.msk [vmem:[#allocation2 + $0x18] sm:$0xff] %vm198_vm1, %v703_v49 }
 0x3ac   :  { %815 = vst.msk [vmem:[#allocation2 + $0x18] sm:$0xff] %vm393_vm2, %v811_v50 }
 0x3ad   :  { %v1034_v51 = vld [vmem:[#allocation2 + $0x10] sm:$0xff] }
 0x3ae   :  { %1172 = vmatmul.msk.f32.gmra.mxu3 %vm121_vm0, %v1034_v51  ;;  %v1027_v52 = vpop.permute.xlu2 %1026 }
 0x3be   :  { %v919_v33 = vpop.permute.xlu0 %918 }
 0x3bf   :  { %923 = vst.msk [vmem:[#allocation2 + $0x18] sm:$0xff] %vm502_vm3, %v919_v33 }
 0x3c0   :  { %1031 = vst.msk [vmem:[#allocation2 + $0x18] sm:$0xff] %vm611_vm4, %v1027_v52 }
 0x3c7   :  { %v1035_v53 = vld [vmem:[#allocation2 + $0x18] sm:$0xff] }
 0x3c8   :  { %1173 = vmatmul.msk.f32.gmra.mxu3 %vm121_vm0, %v1035_v53 }
 0x3fb   :  { %v1077_v56 = vpop.f32.mrf.mxu3 }
 0x3fc   :  { %v1078_v39 = vadd.f32 %v1220_v54, %v1077_v56 }
 0x3fe   :  { %1089 = vst.msk [vmem:[#allocation12] sm:$0xff] %vm121_vm0, %v1078_v39 }
 0x403   :  { %v1080_v57 = vpop.f32.mrf.mxu3 }
 0x404   :  { %v1081_v41 = vadd.f32 %v1220_v54, %v1080_v57 }
 0x406   :  { %1090 = vst.msk [vmem:[#allocation12 + $0x8] sm:$0xff] %vm121_vm0, %v1081_v41 }
 0x431   :  { %v1083_v58 = vpop.f32.mrf.mxu3 }
 0x432   :  { %v1084_v59 = vadd.f32 %v1220_v54, %v1083_v58 }
 0x434   :  { %1091 = vst.msk [vmem:[#allocation12 + $0x10] sm:$0xff] %vm121_vm0, %v1084_v59 }
 0x44b   :  { %v1086_v60 = vpop.f32.mrf.mxu3 }
 0x44c   :  { %v1087_v55 = vadd.f32 %v1220_v54, %v1086_v60 }
 0x44e   :  { %1092 = vst.msk [vmem:[#allocation12 + $0x18] sm:$0xff] %vm121_vm0, %v1087_v55 }
 0x44f   :  { %1105 = dma.vmem_to_hbm [thread:$0]  %s1098_s24, 512, %s1100_s27, [#allocation5], %s1441_s7, %s1441_s7, %s1442_s8  }
 0x450   :  { %1435 = dma.done.wait [#allocation5], 512  }
 0x451   :  { %1436 = vsyncadd [#allocation5], 4294966784 }
 0x452   :  { %1110 = vsyncpa [#allocation4], 1 }
 0x453   :  { %1111 = vsyncpa [#allocation7], 1 }
 0x454   :  { %1112 = vsyncpa [#allocation10], 1 }
 0x455   :  { %1113 = vsyncpa [#allocation5], 1 }

</bundles_post_ra>
